<compile_context>
chip_gen: v7x
topology: tpu7x:2x2x1
jax: 0.10.0
libtpu: 0.0.40
codegen_flags: <defaults>
</compile_context>

<pallas_src>
import functools

import jax
import jax.numpy as jnp
from jax.experimental import pallas as pl
from jax.experimental.pallas import tpu as pltpu

LN_EPS = 1e-5
INV_SQRT2 = 0.7071067811865476
SQRT_2_OVER_PI = 0.7978845608028654


def _round_up(a, b):
    return (a + b - 1) // b * b


def _gelu(h, approximate):
    if approximate:
        # tanh GELU -> EUP slot (effectively free under MXU/VPU slack).
        return 0.5 * h * (1.0 + jnp.tanh(SQRT_2_OVER_PI * (h + 0.044715 * (h * h * h))))
    # exact erf GELU: matches PyTorch nn.GELU() default numerics.
    return 0.5 * h * (1.0 + jax.lax.erf(h * INV_SQRT2))


def _prenorm_residual_kernel(x_ref, g_ref, beta_ref, w1_ref, b1_ref,
                             w2_ref, b2_ref, o_ref, *, d_valid,
                             approximate_gelu, h_chunk):
    """One (tm, Dp) row tile: LayerNorm -> Linear -> GELU -> Linear -> +x."""
    xf = x_ref[...].astype(jnp.float32)          # LN math in f32 (v5e-safe)
    inv_d = jnp.float32(1.0 / d_valid)

    # --- LayerNorm, single-pass stats.  Padded D lanes are zero, so sum(x)
    #     and sum(x*x) only see valid lanes; var = E[x^2] - mean^2. ---
    s1 = jnp.sum(xf, axis=-1, keepdims=True)
    s2 = jnp.sum(xf * xf, axis=-1, keepdims=True)
    mean = s1 * inv_d
    var = jnp.maximum(s2 * inv_d - mean * mean, 0.0)
    xn = (xf - mean) * jax.lax.rsqrt(var + LN_EPS)
    # gamma/beta are f32 (1, Dp) rows; padded lanes are zero so padded lanes
    # of xn come out zero (implicit broadcast, no broadcast_to in the body).
    xn = xn * g_ref[...] + beta_ref[...]

    # --- fn: Linear -> GELU -> Linear.  Matmul operands are cast to the
    #     *weight* dtype (pass bf16 weights on any generation), accumulation
    #     stays f32; biases are added in f32. ---
    xn_c = xn.astype(w1_ref.dtype)
    hp = w1_ref.shape[-1]

    if h_chunk is None or h_chunk >= hp:
        h = jnp.dot(xn_c, w1_ref[...], preferred_element_type=jnp.float32)
        h = _gelu(h + b1_ref[...].astype(jnp.float32), approximate_gelu)
        y = jnp.dot(h.astype(w2_ref.dtype), w2_ref[...],
                    preferred_element_type=jnp.float32)
    else:
        # Hidden-dim chunking: cap the live f32 (tm, h_chunk) activation and
        # accumulate partial W2 products into a (tm, Dp) f32 accumulator.
        n_chunks = hp // h_chunk

        def body(c, acc):
            off = pl.multiple_of(c * h_chunk, h_chunk)
            hc = jnp.dot(xn_c, w1_ref[:, pl.ds(off, h_chunk)],
                         preferred_element_type=jnp.float32)
            hc = _gelu(hc + b1_ref[:, pl.ds(off, h_chunk)].astype(jnp.float32),
                       approximate_gelu)
            return acc + jnp.dot(hc.astype(w2_ref.dtype),
                                 w2_ref[pl.ds(off, h_chunk), :],
                                 preferred_element_type=jnp.float32)

        y = jax.lax.fori_loop(0, n_chunks, body,
                              jnp.zeros(o_ref.shape, jnp.float32))

    y = y + b2_ref[...].astype(jnp.float32)

    # --- residual in f32, single cast to the storage dtype (reference parity;
    #     the x tile is already resident in VMEM so the re-read is cheap). ---
    o_ref[...] = (y + x_ref[...].astype(jnp.float32)).astype(o_ref.dtype)


def _vmem_capacity_bytes():
    try:
        return int(pltpu.get_tpu_info().vmem_capacity_bytes)
    except Exception:
        return 64 * 1024 * 1024          # conservative (v7x-sized) fallback


def prenorm_residual(x, gamma, beta, w1, b1, w2, b2, *,
                     tm=None, approximate_gelu=False, h_chunk=None,
                     double_buffer_weights=False):
    """out = fn(LayerNorm(x)) + x with fn = Linear(D,H) -> GELU -> Linear(H,D).

    x: (B, N, D).  Pass bf16 W1/W2 on *any* generation (v5e/v6e/v7x MXUs are
    bf16-native; f32 operands cost extra MXU passes and double weight DMA) --
    accumulation is always f32.  Keep gamma/beta/b1/b2 in f32 (they are tiny
    and are added to the f32 accumulator).  tm defaults to 256 on small-VMEM
    chips (v7x) and 512 otherwise, and shrinks automatically so the parallel
    grid keeps enough steps to shard across TensorCores / hide DMA.
    """
    B, N, D = x.shape
    H = w1.shape[1]
    M = B * N

    vmem_cap = _vmem_capacity_bytes()
    small_vmem = vmem_cap < 96 * 1024 * 1024      # v7x-like (64 MiB)

    # Lane-dense layout: pad D and H up to multiples of 128 so every load and
    # store is full-vreg (no masked vst.msk partial stores).  Zero padding
    # keeps the math exact.
    Dp = _round_up(D, 128)
    Hp = _round_up(H, 128)

    # Generation-aware row tile (multiple of 8 sublanes), shrunk if the grid
    # would have too few steps to shard across TCs / pipeline the x-tile DMA.
    if tm is None:
        tm = 256 if small_vmem else 512
    min_steps = 8 if small_vmem else 4
    tm = max(8, min(_round_up(tm, 8), _round_up(M, 8)))
    while tm > 8 and pl.cdiv(M, tm) < min_steps:
        tm = max(8, _round_up(tm // 2, 8))
    Mp = _round_up(M, tm)                          # remainder-safe: pad rows
    grid = (pl.cdiv(Mp, tm),)

    # Hidden-dim chunking (mainly for v7x with large H): pick a chunk that is
    # a multiple of 128 and divides Hp, else fall back to the unchunked path.
    if h_chunk is None and small_vmem and Hp >= 2048:
        for cand in (1024, 512, 256):
            if Hp % cand == 0:
                h_chunk = cand
                break
    if h_chunk is not None:
        h_chunk = min(_round_up(h_chunk, 128), Hp)
        if Hp % h_chunk != 0:
            h_chunk = None                          # must divide Hp exactly

    # --- wrapper-side padding: skipped entirely on the no-padding fast path ---
    x2d = x.reshape(M, D)
    if Mp != M or Dp != D:
        x2d = jnp.pad(x2d, ((0, Mp - M), (0, Dp - D)))

    def _row(v, n):
        v = v if v.shape[0] == n else jnp.pad(v, (0, n - v.shape[0]))
        return v.reshape(1, n)

    def _mat(w, r, c):
        if w.shape == (r, c):
            return w
        return jnp.pad(w, ((0, r - w.shape[0]), (0, c - w.shape[1])))

    g2d, be2d = _row(gamma, Dp), _row(beta, Dp)
    w1p, b1p = _mat(w1, Dp, Hp), _row(b1, Hp)
    w2p, b2p = _mat(w2, Hp, Dp), _row(b2, Dp)

    # W1/W2 are grid-invariant: single-buffer them by default (Pallas skips
    # the re-DMA when the block index is unchanged, so double-buffering only
    # wastes VMEM).
    def _wspec(shape):
        if double_buffer_weights:
            return pl.BlockSpec(shape, lambda i: (0, 0))
        return pl.BlockSpec(shape, lambda i: (0, 0),
                            pipeline_mode=pl.Buffered(1))

    # VMEM budget with 2x headroom, capped per-chip at 70% of physical VMEM.
    bx = x.dtype.itemsize
    bw = w1p.dtype.itemsize
    wbuf = 2 if double_buffer_weights else 1
    hc = h_chunk if h_chunk is not None else Hp
    est = (2 * 2 * tm * Dp * bx                    # x + out tiles (double-buffered)
           + wbuf * 2 * Dp * Hp * bw               # W1 + W2 (single-buffered)
           + 8 * (2 * Dp + Hp)                     # gamma/beta/b1/b2 rows (tiny)
           + 4 * tm * hc * 2                       # live f32 hidden chunk + cast
           + 4 * tm * Dp * 3)                      # xn / accumulator / casts
    vmem_limit = int(min(0.7 * vmem_cap, max(16 * 1024 * 1024, 2 * est)))

    kernel = functools.partial(_prenorm_residual_kernel, d_valid=D,
                               approximate_gelu=approximate_gelu,
                               h_chunk=h_chunk)

    out = pl.pallas_call(
        kernel,
        out_shape=jax.ShapeDtypeStruct((Mp, Dp), x.dtype),
        grid_spec=pltpu.PrefetchScalarGridSpec(
            num_scalar_prefetch=0,
            grid=grid,
            in_specs=[
                pl.BlockSpec((tm, Dp), lambda i: (i, 0)),   # x row tile
                pl.BlockSpec((1, Dp), lambda i: (0, 0)),    # gamma (f32)
                pl.BlockSpec((1, Dp), lambda i: (0, 0)),    # beta  (f32)
                _wspec((Dp, Hp)),                           # W1 (grid-invariant)
                pl.BlockSpec((1, Hp), lambda i: (0, 0)),    # b1
                _wspec((Hp, Dp)),                           # W2 (grid-invariant)
                pl.BlockSpec((1, Dp), lambda i: (0, 0)),    # b2
            ],
            out_specs=pl.BlockSpec((tm, Dp), lambda i: (i, 0)),
        ),
        compiler_params=pltpu.CompilerParams(
            dimension_semantics=("parallel",),
            vmem_limit_bytes=vmem_limit),
    )(x2d, g2d, be2d, w1p, b1p, w2p, b2p)

    if Mp == M and Dp == D:
        return out.reshape(B, N, D)
    return out[:M, :D].reshape(B, N, D)


def _reference(x, gamma, beta, w1, b1, w2, b2, *, approximate=False):
    xf = x.astype(jnp.float32)
    mean = jnp.mean(xf, axis=-1, keepdims=True)
    var = jnp.mean((xf - mean) ** 2, axis=-1, keepdims=True)
    xn = (xf - mean) * jax.lax.rsqrt(var + LN_EPS) * gamma + beta
    h = xn @ w1 + b1
    if approximate:
        h = 0.5 * h * (1.0 + jnp.tanh(SQRT_2_OVER_PI * (h + 0.044715 * h ** 3)))
    else:
        h = 0.5 * h * (1.0 + jax.lax.erf(h * INV_SQRT2))
    y = h @ w2 + b2
    return (y + xf).astype(x.dtype)


if __name__ == "__main__":
    B, N, D = 2, 8, 32       # batch, tokens, dim
    H = 8 * D                # MLP hidden (256 -> exercises the H-chunk path)

    key = jax.random.PRNGKey(0)
    kx, kw1, kb1, kw2, kb2 = jax.random.split(key, 5)

    x = jax.random.normal(kx, (B, N, D), dtype=jnp.float32)

    # LayerNorm params: PyTorch default init (gamma=1, beta=0)
    gamma = jnp.ones((D,), dtype=jnp.float32)
    beta = jnp.zeros((D,), dtype=jnp.float32)

    # fn (MLP) params, deterministic
    w1 = jax.random.normal(kw1, (D, H), dtype=jnp.float32) * 0.05
    b1 = jax.random.normal(kb1, (H,), dtype=jnp.float32) * 0.05
    w2 = jax.random.normal(kw2, (H, D), dtype=jnp.float32) * 0.05
    b2 = jax.random.normal(kb2, (D,), dtype=jnp.float32) * 0.05

    ref = _reference(x, gamma, beta, w1, b1, w2, b2)

    # 1) f32 path (exact PyTorch numerics; D padded 32 -> 128, rows padded).
    out = jax.block_until_ready(prenorm_residual(x, gamma, beta, w1, b1, w2, b2))
    assert out.shape == x.shape
    assert jnp.allclose(out, ref, atol=1e-4, rtol=1e-4), "f32 mismatch vs reference"

    # 2) explicit small row tile (multi-step grid / remainder bookkeeping).
    out_t = jax.block_until_ready(
        prenorm_residual(x, gamma, beta, w1, b1, w2, b2, tm=8))
    assert jnp.allclose(out_t, ref, atol=1e-4, rtol=1e-4), "tiled mismatch vs reference"

    # 3) in-kernel hidden-dim chunking (Hp=256, h_chunk=128 -> 2 chunks).
    out_c = jax.block_until_ready(
        prenorm_residual(x, gamma, beta, w1, b1, w2, b2, h_chunk=128))
    assert jnp.allclose(out_c, ref, atol=1e-4, rtol=1e-4), "h-chunk mismatch vs reference"

    # 4) tanh (approximate) GELU path.
    ref_tanh = _reference(x, gamma, beta, w1, b1, w2, b2, approximate=True)
    out_g = jax.block_until_ready(
        prenorm_residual(x, gamma, beta, w1, b1, w2, b2, approximate_gelu=True))
    assert jnp.allclose(out_g, ref_tanh, atol=1e-4, rtol=1e-4), "tanh-GELU mismatch"

    # 5) bf16 MXU-operand path (recommended on v5e/v6e/v7x): bf16 weights,
    #    f32 biases, f32 accumulation inside the kernel.
    w1b, w2b = w1.astype(jnp.bfloat16), w2.astype(jnp.bfloat16)
    out_bf = jax.block_until_ready(
        prenorm_residual(x, gamma, beta, w1b, b1, w2b, b2))
    ref_bf = _reference(x, gamma, beta,
                        w1b.astype(jnp.float32), b1,
                        w2b.astype(jnp.float32), b2)
    assert jnp.allclose(out_bf, ref_bf, atol=5e-2, rtol=5e-2), "bf16 mismatch vs reference"

    print("KERNEL_OK")
</pallas_src>

<mosaic_0001>
module attributes {stable_mosaic.version = 11 : i64} {
  func.func @_prenorm_residual_kernel(%arg0: i32, %arg1: memref<8x128xf32, #tpu.memory_space<vmem>>, %arg2: memref<1x128xf32, #tpu.memory_space<vmem>>, %arg3: memref<1x128xf32, #tpu.memory_space<vmem>>, %arg4: memref<128x256xf32, #tpu.memory_space<vmem>>, %arg5: memref<1x256xf32, #tpu.memory_space<vmem>>, %arg6: memref<256x128xf32, #tpu.memory_space<vmem>>, %arg7: memref<1x128xf32, #tpu.memory_space<vmem>>, %arg8: memref<8x128xf32, #tpu.memory_space<vmem>>) attributes {dimension_semantics = [#tpu.dimension_semantics<parallel>], iteration_bounds = array<i64: 2>, scalar_prefetch = 0 : i64, scratch_operands = 0 : i64, tpu.core_type = #tpu.core_type<tc>, window_params = [{transform_indices = @transform_0, window_bounds = array<i64: 8, 128>}, {pipeline_mode = #tpu.pipeline_mode<synchronous>, transform_indices = @transform_1, window_bounds = array<i64: 1, 128>}, {pipeline_mode = #tpu.pipeline_mode<synchronous>, transform_indices = @transform_2, window_bounds = array<i64: 1, 128>}, {pipeline_mode = #tpu.pipeline_mode<synchronous>, transform_indices = @transform_3, window_bounds = array<i64: 128, 256>}, {pipeline_mode = #tpu.pipeline_mode<synchronous>, transform_indices = @transform_4, window_bounds = array<i64: 1, 256>}, {pipeline_mode = #tpu.pipeline_mode<synchronous>, transform_indices = @transform_5, window_bounds = array<i64: 256, 128>}, {pipeline_mode = #tpu.pipeline_mode<synchronous>, transform_indices = @transform_6, window_bounds = array<i64: 1, 128>}, {transform_indices = @transform_7, window_bounds = array<i64: 8, 128>}]} {
    %c0 = arith.constant 0 : index
    %c0_0 = arith.constant 0 : index
    %0 = vector.load %arg1[%c0, %c0_0] : memref<8x128xf32, #tpu.memory_space<vmem>>, vector<8x128xf32>
    %cst = arith.constant dense<0.000000e+00> : vector<8xf32>
    %1 = vector.multi_reduction <add>, %0, %cst [1] : vector<8x128xf32> to vector<8xf32>
    %2 = vector.shape_cast %1 : vector<8xf32> to vector<8x1xf32>
    %3 = arith.mulf %0, %0 : vector<8x128xf32>
    %cst_1 = arith.constant dense<0.000000e+00> : vector<8xf32>
    %4 = vector.multi_reduction <add>, %3, %cst_1 [1] : vector<8x128xf32> to vector<8xf32>
    %5 = vector.shape_cast %4 : vector<8xf32> to vector<8x1xf32>
    %cst_2 = arith.constant 3.125000e-02 : f32
    %6 = vector.broadcast %cst_2 : f32 to vector<8x1xf32>
    %7 = arith.mulf %2, %6 : vector<8x1xf32>
    %cst_3 = arith.constant 3.125000e-02 : f32
    %8 = vector.broadcast %cst_3 : f32 to vector<8x1xf32>
    %9 = arith.mulf %5, %8 : vector<8x1xf32>
    %10 = arith.mulf %7, %7 : vector<8x1xf32>
    %11 = arith.subf %9, %10 : vector<8x1xf32>
    %cst_4 = arith.constant 0.000000e+00 : f32
    %12 = vector.broadcast %cst_4 : f32 to vector<8x1xf32>
    %13 = arith.maximumf %11, %12 : vector<8x1xf32>
    %14 = vector.broadcast %7 : vector<8x1xf32> to vector<8x128xf32>
    %15 = arith.subf %0, %14 : vector<8x128xf32>
    %cst_5 = arith.constant 9.99999974E-6 : f32
    %16 = vector.broadcast %cst_5 : f32 to vector<8x1xf32>
    %17 = arith.addf %13, %16 : vector<8x1xf32>
    %18 = math.rsqrt %17 : vector<8x1xf32>
    %19 = vector.broadcast %18 : vector<8x1xf32> to vector<8x128xf32>
    %20 = arith.mulf %15, %19 : vector<8x128xf32>
    %c0_6 = arith.constant 0 : index
    %c0_7 = arith.constant 0 : index
    %21 = vector.load %arg2[%c0_6, %c0_7] : memref<1x128xf32, #tpu.memory_space<vmem>>, vector<1x128xf32>
    %22 = vector.broadcast %21 : vector<1x128xf32> to vector<8x128xf32>
    %23 = arith.mulf %20, %22 : vector<8x128xf32>
    %c0_8 = arith.constant 0 : index
    %c0_9 = arith.constant 0 : index
    %24 = vector.load %arg3[%c0_8, %c0_9] : memref<1x128xf32, #tpu.memory_space<vmem>>, vector<1x128xf32>
    %25 = vector.broadcast %24 : vector<1x128xf32> to vector<8x128xf32>
    %26 = arith.addf %23, %25 : vector<8x128xf32>
    %c0_10 = arith.constant 0 : index
    %c0_11 = arith.constant 0 : index
    %27 = vector.load %arg4[%c0_10, %c0_11] : memref<128x256xf32, #tpu.memory_space<vmem>>, vector<128x256xf32>
    %cst_12 = arith.constant dense<0.000000e+00> : vector<8x256xf32>
    %28 = tpu.matmul %26, %27, %cst_12 {dimension_numbers = #tpu.dot_dimension_numbers<[1], [0], [0], [1], [0, 0, 1, 1], [], []>} : vector<8x128xf32>, vector<128x256xf32>, vector<8x256xf32> -> vector<8x256xf32>
    %c0_13 = arith.constant 0 : index
    %c0_14 = arith.constant 0 : index
    %29 = vector.load %arg5[%c0_13, %c0_14] : memref<1x256xf32, #tpu.memory_space<vmem>>, vector<1x256xf32>
    %30 = vector.broadcast %29 : vector<1x256xf32> to vector<8x256xf32>
    %31 = arith.addf %28, %30 : vector<8x256xf32>
    %cst_15 = arith.constant 5.000000e-01 : f32
    %32 = vector.broadcast %cst_15 : f32 to vector<8x256xf32>
    %33 = arith.mulf %32, %31 : vector<8x256xf32>
    %cst_16 = arith.constant 0.707106769 : f32
    %34 = vector.broadcast %cst_16 : f32 to vector<8x256xf32>
    %35 = arith.mulf %31, %34 : vector<8x256xf32>
    %36 = math.erf %35 : vector<8x256xf32>
    %cst_17 = arith.constant 1.000000e+00 : f32
    %37 = vector.broadcast %cst_17 : f32 to vector<8x256xf32>
    %38 = arith.addf %37, %36 : vector<8x256xf32>
    %39 = arith.mulf %33, %38 : vector<8x256xf32>
    %c0_18 = arith.constant 0 : index
    %c0_19 = arith.constant 0 : index
    %40 = vector.load %arg6[%c0_18, %c0_19] : memref<256x128xf32, #tpu.memory_space<vmem>>, vector<256x128xf32>
    %cst_20 = arith.constant dense<0.000000e+00> : vector<8x128xf32>
    %41 = tpu.matmul %39, %40, %cst_20 {dimension_numbers = #tpu.dot_dimension_numbers<[1], [0], [0], [1], [0, 0, 1, 1], [], []>} : vector<8x256xf32>, vector<256x128xf32>, vector<8x128xf32> -> vector<8x128xf32>
    %c0_21 = arith.constant 0 : index
    %c0_22 = arith.constant 0 : index
    %42 = vector.load %arg7[%c0_21, %c0_22] : memref<1x128xf32, #tpu.memory_space<vmem>>, vector<1x128xf32>
    %43 = vector.broadcast %42 : vector<1x128xf32> to vector<8x128xf32>
    %44 = arith.addf %41, %43 : vector<8x128xf32>
    %c0_23 = arith.constant 0 : index
    %c0_24 = arith.constant 0 : index
    %45 = vector.load %arg1[%c0_23, %c0_24] : memref<8x128xf32, #tpu.memory_space<vmem>>, vector<8x128xf32>
    %46 = arith.addf %44, %45 : vector<8x128xf32>
    %c0_25 = arith.constant 0 : index
    %c0_26 = arith.constant 0 : index
    %47 = vector.load %arg8[%c0_25, %c0_26] : memref<8x128xf32, #tpu.memory_space<vmem>>, vector<8x128xf32>
    tpu.vector_store %arg8[%c0_25, %c0_26], %46 {strides = array<i32>} : memref<8x128xf32, #tpu.memory_space<vmem>>, vector<8x128xf32>,
    return
  }
  func.func @transform_0(%arg0: i32) -> (i32, i32) {
    %c0_i32 = arith.constant 0 : i32
    %c0_i32_0 = arith.constant 0 : i32
    return %arg0, %c0_i32 : i32, i32
  }
  func.func @transform_1(%arg0: i32) -> (i32, i32) {
    %c0_i32 = arith.constant 0 : i32
    %c0_i32_0 = arith.constant 0 : i32
    %c0_i32_1 = arith.constant 0 : i32
    return %c0_i32, %c0_i32_0 : i32, i32
  }
  func.func @transform_2(%arg0: i32) -> (i32, i32) {
    %c0_i32 = arith.constant 0 : i32
    %c0_i32_0 = arith.constant 0 : i32
    %c0_i32_1 = arith.constant 0 : i32
    return %c0_i32, %c0_i32_0 : i32, i32
  }
  func.func @transform_3(%arg0: i32) -> (i32, i32) {
    %c0_i32 = arith.constant 0 : i32
    %c0_i32_0 = arith.constant 0 : i32
    %c0_i32_1 = arith.constant 0 : i32
    return %c0_i32, %c0_i32_0 : i32, i32
  }
  func.func @transform_4(%arg0: i32) -> (i32, i32) {
    %c0_i32 = arith.constant 0 : i32
    %c0_i32_0 = arith.constant 0 : i32
    %c0_i32_1 = arith.constant 0 : i32
    return %c0_i32, %c0_i32_0 : i32, i32
  }
  func.func @transform_5(%arg0: i32) -> (i32, i32) {
    %c0_i32 = arith.constant 0 : i32
    %c0_i32_0 = arith.constant 0 : i32
    %c0_i32_1 = arith.constant 0 : i32
    return %c0_i32, %c0_i32_0 : i32, i32
  }
  func.func @transform_6(%arg0: i32) -> (i32, i32) {
    %c0_i32 = arith.constant 0 : i32
    %c0_i32_0 = arith.constant 0 : i32
    %c0_i32_1 = arith.constant 0 : i32
    return %c0_i32, %c0_i32_0 : i32, i32
  }
  func.func @transform_7(%arg0: i32) -> (i32, i32) {
    %c0_i32 = arith.constant 0 : i32
    %c0_i32_0 = arith.constant 0 : i32
    return %arg0, %c0_i32 : i32, i32
  }
}

</mosaic_0001>

<bundles_post_ra>
// kernel: tpu_custom_call.1
= control target key start
LH: loop header
LB: loop body
LE: loop exit
PB: predicated region body
PF: predicated region fallthrough
CT: control target
= control target key end

     0   :  { %12 = vsyncpa [#allocation3], 0  ;;  %s1348_s0 = inlined_call_operand.hbm [shape: f32[16,128], index: 0, kind: input, shape index: {}]   ;;  %s1349_s1 = inlined_call_operand.vmem [shape: f32[1,128], index: 1, kind: input, shape index: {}]   ;;  %s1350_s2 = inlined_call_operand.vmem [shape: f32[1,128], index: 2, kind: input, shape index: {}]   ;;  %s1351_s3 = inlined_call_operand.hbm [shape: f32[128,256], index: 3, kind: input, shape index: {}]   ;;  %s1352_s4 = inlined_call_operand.vmem [shape: f32[1,256], index: 4, kind: input, shape index: {}]   ;;  %s1353_s5 = inlined_call_operand.hbm [shape: f32[256,128], index: 5, kind: input, shape index: {}]   ;;  %s1354_s6 = inlined_call_operand.vmem [shape: f32[1,128], index: 6, kind: input, shape index: {}]   ;;  %s1355_s7 = inlined_call_operand.hbm [shape: f32[16,128], index: 7, kind: output, shape index: {}]  }
   0x1   :  { %14 = vsyncpa [#allocation3 + $0x1], 0 }
   0x2   :  { %15 = vsyncpa [#allocation6], 0 }
   0x3   :  { %16 = vsyncpa [#allocation4], 0 }
   0x4   :  { %18 = vsyncpa [#allocation4 + $0x1], 0  ;;  %s1096_s24 = smov 0   ;;  %s1098_s25 = smov 0  }
   0x5   :  { %s1100_s26 = smov 0   ;;  %s1102_s27 = smov 0  }
   0x6 LB: > { %s1117_s28 = sadd.s32 4294967295, %s1045_s27   ;;  %s693_s29 = sadd.s32 4294967294, %s1045_s27   ;;  %s1045_s27 = sphi %s1102_s27, %s1375_s27   ;;  %s1041_s26 = sphi %s1100_s26, %s1374_s26   ;;  %s1037_s25 = sphi %s1098_s25, %s1373_s25   ;;  %s1033_s24 = sphi %s1096_s24, %s1372_s24  }
   0x7   : > { %p44_p0 = scmp.ne.s32.totalorder %s1037_s25, %s1033_s24  ;;  %p1356_p1 = scmp.eq.s32.totalorder %s1117_s28, 0 }
   0x8   : > { %p200_p3 = scmp.eq.s32.totalorder %s693_s29, 1  ;;  %p694_p5 = scmp.ge.s32.totalorder %s1045_s27, 1 }
   0x9   : > { %p1126_p4 = por %p1356_p1, %p44_p0  ;;  %p207_p7 = scmp.lt.s32.totalorder %s1045_s27, 3 }
   0xa   : > { %p1131_p6 = por %p200_p3, %p44_p0  ;;  %s1047_s10 = smov [#allocation5]  }
   0xb   : > { %s1359_s30 = scalar_select %p1126_p4, 1, 0 }
   0xc   : > { %s1360_s8 = scalar_select %p1131_p6, 1, 0 }
   0xd   : > { %p1136_p8 = pnand %p694_p5, %p207_p7  ;;  %s225_s11 = sshll.u32 %s1047_s10, 4  ;;  %s1140_s11 = int_to_ptr.vmem [resolvable:$true] %s225_s11 }
   0xe   : > { %s1048_s13 = smov [#allocation7]   ;;  %s889_s17 = scalar_lea.hbm %s1351_s3, 4096 }
   0xf   : > { %p823_p9 = pneg %p1136_p8  ;;  %s241_s14 = sshll.u32 %s1048_s13, 4  ;;  %s1151_s14 = int_to_ptr.vmem [resolvable:$true] %s241_s14 }
  0x10   : > { %p890_p12 = scmp.ne.s32.totalorder %s1351_s3, %s889_s17  ;;  %p896_p5 = scmp.lt.u32.totalorder %s889_s17, %s1351_s3 }
  0x11   : > { %p1147_p11 = pnand %p823_p9, %p1356_p1 }
  0x13   : > { %p891_p13 = pneg %p1147_p11 }
  0x15   : > { %p892_p0 = pnand %p891_p13, %p890_p12 }
  0x17   : > { %p893_p3 = pneg %p892_p0 }
  0x19   : > { %p898_p7 = pnand %p896_p5, %p893_p3 }
  0x1b   : > { %901 = shalt.err (!%p898_p7)
}
  0x1c   : > { %s902_s22 = scalar_lea.vmem %s1140_s11, 4096  ;;  %p910_p2 = scmp.lt.s32.totalorder %s1140_s11, %s1140_s11 }
  0x1d   : > { %p903_p9 = scmp.ne.s32.totalorder %s1140_s11, %s902_s22  ;;  %p911_p12 = scmp.lt.s32.totalorder %s902_s22, %s902_s22 }
  0x1f   : > { %p905_p10 = pnand %p903_p9, %p891_p13  ;;  %p912_p0 = por %p911_p12, %p910_p2 }
  0x21   : > { %p906_p1 = pneg %p905_p10 }
  0x23   : > { %p913_p6 = pnand %p912_p0, %p906_p1 }
  0x25   : > { %916 = shalt.err (!%p913_p6)
}
  0x26   : > { %s1049_s23 = smov 256   ;;  %s1050_s29 = smov 16  }
  0x27   : > { %826 = dma.hbm_to_vmem [thread:$0]  (!%p1147_p11), %s1351_s3, 4096, %s1140_s11, [#allocation6], %s1049_s23, %s1049_s23, %s1050_s29  }
  0x28   : > { %s917_s17 = scalar_lea.hbm %s1353_s5, 4096 }
  0x29   : > { %p918_p2 = scmp.ne.s32.totalorder %s1353_s5, %s917_s17  ;;  %p924_p10 = scmp.lt.u32.totalorder %s917_s17, %s1353_s5 }
  0x2b   : > { %p920_p1 = pnand %p918_p2, %p891_p13 }
  0x2d   : > { %p921_p6 = pneg %p920_p1 }
  0x2f   : > { %p926_p3 = pnand %p924_p10, %p921_p6 }
  0x31   : > { %929 = shalt.err (!%p926_p3)
}
  0x32   : > { %s930_s11 = scalar_lea.vmem %s1151_s14, 4096  ;;  %p938_p12 = scmp.lt.s32.totalorder %s1151_s14, %s1151_s14 }
  0x33   : > { %p931_p5 = scmp.ne.s32.totalorder %s1151_s14, %s930_s11  ;;  %p939_p0 = scmp.lt.s32.totalorder %s930_s11, %s930_s11 }
  0x35   : > { %p933_p7 = pnand %p931_p5, %p891_p13  ;;  %p940_p2 = por %p939_p0, %p938_p12 }
  0x37   : > { %p934_p9 = pneg %p933_p7 }
  0x39   : > { %p941_p1 = pnand %p940_p2, %p934_p9 }
  0x3b   : > { %944 = shalt.err (!%p941_p1)
}
  0x3c   : > { %s1051_s22 = smov 128   ;;  %s1052_s23 = smov 8  }
  0x3d   : > { %829 = dma.hbm_to_vmem [thread:$0]  (!%p1147_p11), %s1353_s5, 4096, %s1151_s14, [#allocation6], %s1051_s22, %s1051_s22, %s1052_s23  }
  0x3e   : > { %s1206_s13 = sadd.s32 1, %s1045_s27   ;;  %s31_s16 = sadd.s32 1, %s1041_s26 }
  0x3f   : > { %s28_s15 = ssub.s32 %s1045_s27, %s1206_s13  ;;  %p38_p6 = scmp.ne.s32.totalorder %s1041_s26, %s1037_s25 }
  0x40   : > { %p29_p13 = scmp.eq.s32.totalorder %s28_s15, 0  ;;  %p39_p10 = scmp.eq.s32.totalorder %s1045_s27, 0 }
  0x41   : > { %p1363_p5 = scmp.eq.s32.totalorder %s1117_s28, 1  ;;  %p840_p9 = scmp.lt.s32.totalorder %s1045_s27, 2 }
  0x42   : > { %s1215_s17 = scalar_select %p29_p13, %s1041_s26, %s31_s16  }
  0x43   : > { %p40_p3 = por %p39_p10, %p38_p6  ;;  %p1219_p7 = por %p1363_p5, %p38_p6 }
  0x44   : > { %s258_s12 = sand.u32 1, %s1041_s26   ;;  %s699_s14 = sshll.u32 %s1045_s27, 7 }
  0x45   : > { %s1364_s18 = scalar_select %p1219_p7, 1, 0 }
  0x46   : > { %s698_s19 = sshll.u32 %s258_s12, 3  ;;  %s1229_s11 = scalar_lea.hbm %s1348_s0, %s699_s14 }
  0x47   : > { %s262_s22 = scalar_lea.vmem [#allocation2], %s698_s19  ;;  %p1233_p11 = pnand %p840_p9, %p40_p3 }
  0x48   : > { %s269_s23 = sshll.u32 %s262_s22, 4  ;;  %s259_s10 = scalar_lea.sflag [#allocation3], %s258_s12  ;;  %s1231_s23 = int_to_ptr.vmem [resolvable:$true] %s269_s23 }
  0x49   : > { %s945_s15 = scalar_lea.hbm %s1229_s11, 128  ;;  %p947_p0 = pneg %p1233_p11 }
  0x4a   : > { %p946_p12 = scmp.ne.s32.totalorder %s1229_s11, %s945_s15  ;;  %s950_s14 = scalar_lea.hbm %s1348_s0, 256 }
  0x4b   : > { %p951_p13 = scmp.lt.u32.totalorder %s1229_s11, %s1348_s0  ;;  %p952_p6 = scmp.lt.u32.totalorder %s950_s14, %s945_s15 }
  0x4c   : > { %p948_p2 = pnand %p947_p0, %p946_p12  ;;  %p954_p3 = scmp.lt.u32.totalorder %s945_s15, %s1229_s11 }
  0x4d   : > { %p953_p10 = por %p952_p6, %p951_p13 }
  0x4e   : > { %p949_p1 = pneg %p948_p2 }
  0x4f   : > { %p955_p5 = por %p954_p3, %p953_p10 }
  0x51   : > { %p956_p9 = pnand %p955_p5, %p949_p1 }
  0x53   : > { %959 = shalt.err (!%p956_p9)
}
  0x54   : > { %s960_s12 = scalar_lea.vmem %s1231_s23, 128  ;;  %s1053_s22 = smov [#allocation2]  }
  0x55   : > { %p961_p12 = scmp.ne.s32.totalorder %s1231_s23, %s960_s12  ;;  %s965_s16 = sshll.u32 %s1053_s22, 4  ;;  %s966_s16 = int_to_ptr.vmem [resolvable:$false] %s965_s16 }
  0x56   : > { %s967_s19 = scalar_lea.vmem %s966_s16, 256  ;;  %p968_p4 = scmp.lt.s32.totalorder %s1231_s23, %s966_s16 }
  0x57   : > { %p963_p2 = pnand %p961_p12, %p947_p0  ;;  %p969_p13 = scmp.lt.s32.totalorder %s967_s19, %s960_s12 }
  0x59   : > { %p964_p7 = pneg %p963_p2  ;;  %p970_p6 = por %p969_p13, %p968_p4 }
  0x5b   : > { %p971_p10 = pnand %p970_p6, %p964_p7 }
  0x5d   : > { %974 = shalt.err (!%p971_p10)
}
  0x5e   : > { %833 = dma.hbm_to_vmem [thread:$0]  (!%p1233_p11), %s1229_s11, 128, %s1231_s23, %s259_s10  }
  0x5f   : > { %278 = sbr.rel (%p1136_p8) target bundleno = 744 (0x2e8), region = 48  ;;  %s1265_s15 = sand.u32 (!%p1136_p8), 1, %s1037_s25  }
  0x60   : > { %s701_s14 = sshll.u32 (!%p1136_p8), %s1265_s15, 3  ;;  %s281_s20 = scalar_lea.sflag (!%p1136_p8), [#allocation3], %s1265_s15 }
  0x61   : > { %s284_s21 = scalar_lea.vmem (!%p1136_p8), [#allocation2], %s701_s14  ;;  %p1366_p4 = scmp.ne.s32.totalorder (!%p1136_p8), %s1359_s30, 0 }
  0x66   : > { %1020 = dma.done.wait (%p1366_p4), %s281_s20, 128  }
  0x67   : > { %1022 = vsyncadd (%p1366_p4), %s281_s20, 4294967168  ;;  %p1367_p7 = scmp.eq.s32.totalorder %s1117_s28, 0 }
  0x69   : > { %1024 = dma.done.wait (%p1367_p7), [#allocation6], 8192   ;;  %p1368_p8 = pmov %p1367_p7 }
  0x6a   : > { %v1279_v0 = vld [vmem:[%s284_s21] sm:$0xff]  ;;  %v355_v1 = vld [vmem:[#allocation5 + $0x8] sm:$0xff]  ;;  %v354_v5 = vld [vmem:[#allocation5] sm:$0xff]  ;;  %v1054_v39 = vmov 0.0   ;;  %s709_s16 = sshll.u32 %s1117_s28, 7  ;;  %s322_s19 = scalar_lea.vmem [#allocation8], %s701_s14 }
  0x6b   : > { %1026 = vsyncadd (%p1368_p8), [#allocation6], 4294959104  ;;  %v357_v2 = vld [vmem:[#allocation5 + $0x18] sm:$0xff]  ;;  %324 = vadd.xlane.f32.xlu0 %v1279_v0  ;;  %v326_v3 = vmul.f32 %v1279_v0, %v1279_v0  ;;  %v356_v6 = vld [vmem:[#allocation5 + $0x10] sm:$0xff]  ;;  %462 = vmatprep.mubr.f32.mxu0 %v1054_v39  ;;  %s604_s20 = sshll.u32 %s322_s19, 4  ;;  %s1304_s9 = scalar_lea.hbm %s1355_s7, %s709_s16  ;;  %s1306_s20 = int_to_ptr.vmem [resolvable:$true] %s604_s20 }
  0x6c   : > { %v747_v4 = vpack.c.bf16 %v357_v2, %v355_v1  ;;  %v749_v7 = vpack.c.bf16 %v356_v6, %v354_v5  ;;  %v359_v8 = vld [vmem:[#allocation5 + $0x28] sm:$0xff]  ;;  %v361_v9 = vld [vmem:[#allocation5 + $0x38] sm:$0xff]  ;;  %v358_v11 = vld [vmem:[#allocation5 + $0x20] sm:$0xff]  ;;  %s591_s11 = scalar_lea.sflag [#allocation4], %s1265_s15  ;;  %s975_s23 = scalar_lea.vmem %s1306_s20, 128 }
  0x6d   : > { %v751_v10 = vpack.c.bf16 %v361_v9, %v359_v8  ;;  %v360_v12 = vld [vmem:[#allocation5 + $0x30] sm:$0xff]  ;;  %v363_v14 = vld [vmem:[#allocation5 + $0x48] sm:$0xff]  ;;  %v365_v15 = vld [vmem:[#allocation5 + $0x58] sm:$0xff]  ;;  %p976_p11 = scmp.ne.s32.totalorder %s1306_s20, %s975_s23  ;;  %p1369_p0 = scmp.ne.s32.totalorder %s1364_s18, 0 }
  0x6e   : > { %748 = vmatprep.subr.bf16.mxu0 %v747_v4  ;;  %v753_v13 = vpack.c.bf16 %v360_v12, %v358_v11  ;;  %v755_v16 = vpack.c.bf16 %v365_v15, %v363_v14  ;;  %v362_v17 = vld [vmem:[#allocation5 + $0x40] sm:$0xff]  ;;  %v364_v18 = vld [vmem:[#allocation5 + $0x50] sm:$0xff]  ;;  %v367_v20 = vld [vmem:[#allocation5 + $0x68] sm:$0xff]  ;;  %s1055_s28 = smov [#allocation8]  }
  0x6f   : > { %750 = vmatpush1.bf16.msra.mxu0 %v749_v7  ;;  %327 = vadd.xlane.f32.xlu0 %v326_v3  ;;  %v757_v19 = vpack.c.bf16 %v364_v18, %v362_v17  ;;  %v369_v21 = vld [vmem:[#allocation5 + $0x78] sm:$0xff]  ;;  %v366_v23 = vld [vmem:[#allocation5 + $0x60] sm:$0xff]  ;;  %v368_v24 = vld [vmem:[#allocation5 + $0x70] sm:$0xff]  ;;  %p977_p1 = pnand %p976_p11, %p1369_p0  ;;  %s979_s14 = sshll.u32 %s1055_s28, 4  ;;  %s980_s14 = int_to_ptr.vmem [resolvable:$false] %s979_s14 }
  0x70   : > { %752 = vmatprep.subr.bf16.mxu0 %v751_v10  ;;  %v759_v22 = vpack.c.bf16 %v369_v21, %v367_v20  ;;  %v761_v25 = vpack.c.bf16 %v368_v24, %v366_v23  ;;  %v371_v26 = vld [vmem:[#allocation5 + $0x88] sm:$0xff]  ;;  %v373_v27 = vld [vmem:[#allocation5 + $0x98] sm:$0xff]  ;;  %v370_v29 = vld [vmem:[#allocation5 + $0x80] sm:$0xff]  ;;  %s981_s29 = scalar_lea.vmem %s980_s14, 256  ;;  %p982_p5 = scmp.lt.s32.totalorder %s1306_s20, %s980_s14 }
  0x71   : > { %v763_v28 = vpack.c.bf16 %v373_v27, %v371_v26  ;;  %v372_v30 = vld [vmem:[#allocation5 + $0x90] sm:$0xff]  ;;  %v375_v32 = vld [vmem:[#allocation5 + $0xa8] sm:$0xff]  ;;  %v377_v33 = vld [vmem:[#allocation5 + $0xb8] sm:$0xff]  ;;  %p978_p3 = pneg %p977_p1  ;;  %p983_p9 = scmp.lt.s32.totalorder %s981_s29, %s975_s23 }
  0x72   : > { %v765_v31 = vpack.c.bf16 %v372_v30, %v370_v29  ;;  %v374_v34 = vld [vmem:[#allocation5 + $0xa0] sm:$0xff]  ;;  %v767_v35 = vpack.c.bf16 %v377_v33, %v375_v32  ;;  %v376_v36 = vld [vmem:[#allocation5 + $0xb0] sm:$0xff]  ;;  %v379_v37 = vld [vmem:[#allocation5 + $0xc8] sm:$0xff] }
  0x73   : > { %754 = vmatpush1.bf16.msra.mxu0 %v753_v13  ;;  %v381_v38 = vld [vmem:[#allocation5 + $0xd8] sm:$0xff]  ;;  %v769_v40 = vpack.c.bf16 %v376_v36, %v374_v34  ;;  %v378_v42 = vld [vmem:[#allocation5 + $0xc0] sm:$0xff]  ;;  %v380_v43 = vld [vmem:[#allocation5 + $0xd0] sm:$0xff]  ;;  %p984_p12 = por %p983_p9, %p982_p5 }
  0x74   : > { %756 = vmatprep.subr.bf16.mxu0 %v755_v16  ;;  %v771_v41 = vpack.c.bf16 %v381_v38, %v379_v37  ;;  %v383_v44 = vld [vmem:[#allocation5 + $0xe8] sm:$0xff]  ;;  %v385_v45 = vld [vmem:[#allocation5 + $0xf8] sm:$0xff]  ;;  %v773_v46 = vpack.c.bf16 %v380_v43, %v378_v42  ;;  %v382_v48 = vld [vmem:[#allocation5 + $0xe0] sm:$0xff] }
  0x75   : > { %v775_v47 = vpack.c.bf16 %v385_v45, %v383_v44  ;;  %v384_v49 = vld [vmem:[#allocation5 + $0xf0] sm:$0xff]  ;;  %v495_v51 = vld [vmem:[#allocation7 + $0x80] sm:$0xff]  ;;  %v496_v52 = vld [vmem:[#allocation7 + $0x88] sm:$0xff]  ;;  %p985_p2 = pnand %p984_p12, %p978_p3 }
  0x76   : > { %v777_v50 = vpack.c.bf16 %v384_v49, %v382_v48  ;;  %v479_v53 = vld [vmem:[#allocation7] sm:$0xff]  ;;  %v779_v54 = vpack.c.bf16 %v496_v52, %v495_v51  ;;  %v480_v55 = vld [vmem:[#allocation7 + $0x8] sm:$0xff]  ;;  %v497_v56 = vld [vmem:[#allocation7 + $0x90] sm:$0xff]  ;;  %v388_v51 = vlaneseq }
  0x77   : > { %758 = vmatpush1.bf16.msra.mxu0 %v757_v19  ;;  %v498_v57 = vld [vmem:[#allocation7 + $0x98] sm:$0xff]  ;;  %v781_v58 = vpack.c.bf16 %v480_v55, %v479_v53  ;;  %v481_v60 = vld [vmem:[#allocation7 + $0x10] sm:$0xff]  ;;  %v499_v62 = vld [vmem:[#allocation7 + $0xa0] sm:$0xff] }
  0x78   : > { %760 = vmatprep.subr.bf16.mxu0 %v759_v22  ;;  %v783_v59 = vpack.c.bf16 %v498_v57, %v497_v56  ;;  %v482_v61 = vld [vmem:[#allocation7 + $0x18] sm:$0xff]  ;;  %780 = vmatprep.subr.bf16.mxu1 %v779_v54  ;;  %v500_v63 = vld [vmem:[#allocation7 + $0xa8] sm:$0xff]  ;;  %v483_v3 = vld [vmem:[#allocation7 + $0x20] sm:$0xff]  ;;  %v389_v52 = vshrl.u32 %v388_v51, 7 }
  0x79   : > { %782 = vmatpush3.bf16.msra.mxu1 %v781_v58  ;;  %v785_v1 = vpack.c.bf16 %v482_v61, %v481_v60  ;;  %v787_v2 = vpack.c.bf16 %v500_v63, %v499_v62  ;;  %v484_v4 = vld [vmem:[#allocation7 + $0x28] sm:$0xff]  ;;  %v705_v16 = vld [vmem:[%s1349_s1] ss:$0 sm:$0xff]  ;;  %v502_v22 = vld [vmem:[#allocation7 + $0xb8] sm:$0xff] }
  0x7a   : > { %784 = vmatprep.subr.bf16.mxu1 %v783_v59  ;;  %v789_v5 = vpack.c.bf16 %v484_v4, %v483_v3  ;;  %v706_v18 = vld [vmem:[%s1350_s2] ss:$0 sm:$0xff]  ;;  %v503_v27 = vld [vmem:[#allocation7 + $0xc0] sm:$0xff]  ;;  %v506_v34 = vld [vmem:[#allocation7 + $0xd8] sm:$0xff]  ;;  %v390_v53 = vsub.s32 0, %v389_v52  ;;  %v394_v55 = vsub.s32 1, %v389_v52 }
  0x7b   : > { %762 = vmatpush1.bf16.msra.mxu0 %v761_v25  ;;  %v501_v21 = vld [vmem:[#allocation7 + $0xb0] sm:$0xff]  ;;  %v486_v25 = vld [vmem:[#allocation7 + $0x38] sm:$0xff]  ;;  %v487_v30 = vld [vmem:[#allocation7 + $0x40] sm:$0xff] }
  0x7c   : > { %764 = vmatprep.subr.bf16.mxu0 %v763_v28  ;;  %v791_v23 = vpack.c.bf16 %v502_v22, %v501_v21  ;;  %v485_v24 = vld [vmem:[#allocation7 + $0x30] sm:$0xff]  ;;  %v504_v28 = vld [vmem:[#allocation7 + $0xc8] sm:$0xff]  ;;  %v490_v37 = vld [vmem:[#allocation7 + $0x58] sm:$0xff] }
  0x7d   : > { %786 = vmatpush3.bf16.msra.mxu1 %v785_v1  ;;  %v793_v26 = vpack.c.bf16 %v486_v25, %v485_v24  ;;  %v795_v29 = vpack.c.bf16 %v504_v28, %v503_v27  ;;  %v505_v33 = vld [vmem:[#allocation7 + $0xd0] sm:$0xff]  ;;  %v507_v39 = vld [vmem:[#allocation7 + $0xe0] sm:$0xff]  ;;  %v492_v43 = vld [vmem:[#allocation7 + $0x68] sm:$0xff] }
  0x7e   : > { %788 = vmatprep.subr.bf16.mxu1 %v787_v2  ;;  %v489_v36 = vld [vmem:[#allocation7 + $0x50] sm:$0xff]  ;;  %v491_v42 = vld [vmem:[#allocation7 + $0x60] sm:$0xff]  ;;  %v494_v49 = vld [vmem:[#allocation7 + $0x78] sm:$0xff] }
  0x7f   : > { %766 = vmatpush1.bf16.msra.mxu0 %v765_v31  ;;  %v488_v31 = vld [vmem:[#allocation7 + $0x48] sm:$0xff]  ;;  %v801_v38 = vpack.c.bf16 %v490_v37, %v489_v36  ;;  %v805_v44 = vpack.c.bf16 %v492_v43, %v491_v42  ;;  %v509_v45 = vld [vmem:[#allocation7 + $0xf0] sm:$0xff] }
  0x80   : > { %768 = vmatprep.subr.bf16.mxu0 %v767_v35  ;;  %v797_v32 = vpack.c.bf16 %v488_v31, %v487_v30  ;;  %v799_v35 = vpack.c.bf16 %v506_v34, %v505_v33  ;;  %v493_v48 = vld [vmem:[#allocation7 + $0x70] sm:$0xff] }
  0x81   : > { %790 = vmatpush3.bf16.msra.mxu1 %v789_v5  ;;  %v386_v54 = vld [vmem:[%s1352_s4] sm:$0x3] }
  0x82   : > { %792 = vmatprep.subr.bf16.mxu1 %v791_v23  ;;  %v391_v56 = vrot.slane %v386_v54, %v390_v53  ;;  %v395_v57 = vrot.slane %v386_v54, %v394_v55 }
  0x83   : > { %770 = vmatpush1.bf16.msra.mxu0 %v769_v40  ;;  %v508_v40 = vld [vmem:[#allocation7 + $0xe8] sm:$0xff] }
  0x84   : > { %772 = vmatprep.subr.bf16.mxu0 %v771_v41  ;;  %v803_v41 = vpack.c.bf16 %v508_v40, %v507_v39 }
  0x85   : > { %794 = vmatpush3.bf16.msra.mxu1 %v793_v26 }
  0x86   : > { %796 = vmatprep.subr.bf16.mxu1 %v795_v29 }
  0x87   : > { %774 = vmatpush1.bf16.msra.mxu0 %v773_v46  ;;  %v510_v46 = vld [vmem:[#allocation7 + $0xf8] sm:$0xff] }
  0x88   : > { %776 = vmatprep.subr.bf16.mxu0 %v775_v47  ;;  %v807_v47 = vpack.c.bf16 %v510_v46, %v509_v45 }
  0x89   : > { %798 = vmatpush3.bf16.msra.mxu1 %v797_v32 }
  0x8a   : > { %800 = vmatprep.subr.bf16.mxu1 %v799_v35 }
  0x8b   : > { %778 = vmatpush1.bf16.msra.mxu0 %v777_v50  ;;  %v809_v50 = vpack.c.bf16 %v494_v49, %v493_v48 }
  0x8d   : > { %802 = vmatpush3.bf16.msra.mxu1 %v801_v38 }
  0x8e   : > { %804 = vmatprep.subr.bf16.mxu1 %v803_v41 }
  0x91   : > { %806 = vmatpush3.bf16.msra.mxu1 %v805_v44 }
  0x92   : > { %808 = vmatprep.subr.bf16.mxu1 %v807_v47 }
  0x95   : > { %810 = vmatpush3.bf16.msra.mxu1 %v809_v50 }
  0xf8   : > { %v325_v6 = vpop.xlane.xlu0 %324 }
  0xf9   : > { %v329_v7 = vmul.f32 0.03125, %v325_v6 }
  0xfb   : > { %v331_v9 = vmul.f32 %v329_v7, %v329_v7  ;;  %v334_v14 = vsub.f32 %v1279_v0, %v329_v7 }
  0xfc   : > { %v328_v8 = vpop.xlane.xlu0 %327 }
  0xfd   : > { %v330_v10 = vmul.f32 0.03125, %v328_v8 }
  0xff   : > { %v332_v11 = vsub.f32 %v330_v10, %v331_v9  ;;  %v707_v10 = vld [vmem:[%s1354_s6] ss:$0 sm:$0xff] }
 0x101   : > { %v333_v12 = vmax.f32 %v332_v11, 0.0 }
 0x103   : > { %v335_v13 = vadd.f32 1e-05, %v333_v12 }
 0x105   : > { %883 = vrsqrt.f32 %v335_v13 }
 0x10f   : > { %v884_v15 = vpop.eup %883 }
 0x110   : > { %v337_v17 = vmul.f32 %v884_v15, %v334_v14 }
 0x112   : > { %v345_v19 = vmul.f32 %v705_v16, %v337_v17 }
 0x114   : > { %v353_v20 = vadd.f32 %v706_v18, %v345_v19 }
 0x116   : > { %463 = vmatmul.mubr.f32.vlgmr.msra.gmra.mrb[0].mxu0 %v353_v20 }
 0x1e9   : > { %v464_v58 = vpop.f32.mrb[0].mxu0 }
 0x1ea   : > { %v465_v59 = vadd.f32 %v464_v58, %v391_v56  ;;  %v466_v60 = vpop.f32.mrb[1].mxu0 }
 0x1eb   : > { %v467_v61 = vadd.f32 %v466_v60, %v395_v57 }
 0x1ec   : > { %v471_v62 = vmul.f32 0.70710677, %v465_v59  ;;  %v469_v6 = vmul.f32 0.5, %v465_v59 }
 0x1ed   : > { %v472_v63 = vmul.f32 0.70710677, %v467_v61  ;;  %v470_v4 = vmul.f32 0.5, %v467_v61 }
 0x1ee   : > { %885 = verf.f32 %v471_v62 }
 0x1ef   : > { %887 = verf.f32 %v472_v63 }
 0x1f8   : > { %v886_v1 = vpop.eup %885 }
 0x1f9   : > { %v888_v2 = vpop.eup %887  ;;  %v475_v3 = vadd.f32 1.0, %v886_v1 }
 0x1fa   : > { %v476_v5 = vadd.f32 1.0, %v888_v2 }
 0x1fb   : > { %v477_v8 = vmul.f32 %v475_v3, %v469_v6 }
 0x1fc   : > { %v478_v7 = vmul.f32 %v476_v5, %v470_v4 }
 0x1fe   : > { %582 = vmatprep.mubr.f32.mxu1 %v478_v7 }
 0x1ff   : > { %583 = vmatmul.mubr.f32.vlgmr.msra.gmra.mrb[0].mxu1 %v477_v8 }
 0x2d2   : > { %v744_v9 = vpop.f32.mrb[0].mxu1 }
 0x2d3   : > { %v745_v11 = vpop.f32.mrb[1].mxu1 }
 0x2d4   : > { %v746_v12 = vadd.f32 %v745_v11, %v744_v9 }
 0x2d6   : > { %v585_v13 = vadd.f32 %v746_v12, %v707_v10 }
 0x2d8   : > { %v588_v14 = vadd.f32 %v585_v13, %v1279_v0 }
 0x2da   : > { %589 = vst [vmem:[%s322_s19] sm:$0xff] %v588_v14 }
 0x2db   : > { %988 = shalt.err (!%p985_p2)
}
 0x2dc   : > { %s989_s15 = scalar_lea.hbm %s1304_s9, 128  ;;  %s993_s22 = scalar_lea.hbm %s1355_s7, 256 }
 0x2dd   : > { %p990_p13 = scmp.ne.s32.totalorder %s1304_s9, %s989_s15  ;;  %p994_p4 = scmp.lt.u32.totalorder %s1304_s9, %s1355_s7 }
 0x2de   : > { %p995_p7 = scmp.lt.u32.totalorder %s993_s22, %s989_s15  ;;  %p997_p11 = scmp.lt.u32.totalorder %s989_s15, %s1304_s9 }
 0x2df   : > { %p991_p6 = pnand %p990_p13, %p1369_p0 }
 0x2e0   : > { %p996_p8 = por %p995_p7, %p994_p4 }
 0x2e1   : > { %p992_p10 = pneg %p991_p6 }
 0x2e2   : > { %p998_p1 = por %p997_p11, %p996_p8 }
 0x2e4   : > { %p999_p3 = pnand %p998_p1, %p992_p10 }
 0x2e6   : > { %1002 = shalt.err (!%p999_p3)
}
 0x2e7   : > { %821 = dma.vmem_to_hbm [thread:$0]  (%p1369_p0), %s1306_s20, 128, %s1304_s9, %s591_s11  }
 0x2e8 PF: > { %s616_s21 = sand.u32 1, %s1033_s24   ;;  %p1370_p5 = scmp.ne.s32.totalorder %s1360_s8, 0 }
 0x2e9   : > { %p1371_p9 = scmp.ge.s32.totalorder %s1045_s27, 2  ;;  %s617_s30 = scalar_lea.sflag [#allocation4], %s616_s21 }
 0x2eb   : > { %p835_p12 = pnand %p1371_p9, %p1370_p5 }
 0x2ed   : > { %1028 = dma.done.wait (!%p835_p12), %s617_s30, 128  }
 0x2ee   : > { %1030 = vsyncadd (!%p835_p12), %s617_s30, 4294967168  ;;  %p21_p2 = scmp.ge.s32.totalorder %s1206_s13, 4   ;;  %s1372_s24 = smov %s1037_s25 }
 0x2ef   : > { %s1373_s25 = smov %s1041_s26  ;;  %s1374_s26 = smov %s1215_s17 }
 0x2f0   : > { %s1375_s27 = smov %s1206_s13  ;;  %23 = sbr.rel (!%p21_p2) target bundleno = 6 (0x6), region = 101 }
 0x2f7   :  { %622 = vsyncpa [#allocation3], 1 }
 0x2f8   :  { %624 = vsyncpa [#allocation3 + $0x1], 1 }
 0x2f9   :  { %625 = vsyncpa [#allocation6], 1 }
 0x2fa   :  { %626 = vsyncpa [#allocation4], 1 }
 0x2fb   :  { %628 = vsyncpa [#allocation4 + $0x1], 1 }

</bundles_post_ra>
